<compile_context>
chip_gen: v6e
topology: v6e:2x2x1
jax: 0.10.0
libtpu: 0.0.40
codegen_flags: <defaults>
</compile_context>

<pallas_src>
import jax
import jax.numpy as jnp
from jax.experimental import pallas as pl
from jax.experimental.pallas import tpu as pltpu


def _make_tcn_bn_kernel(K, V, C_in, C_out, L_out):
    """Fused temporal-conv + folded-BN kernel (stride=1)."""

    def kernel(x_ref, w_ref, b_ref, o_ref):
        # x_ref: (1, C_in, L_pad)  time-major flattened, zero-padded in time
        # w_ref: (K, C_out, C_in)  BN-folded conv weights
        # b_ref: (C_out, 1)        BN-folded bias
        # o_ref: (1, C_out, L_out) with L_out = T_out * V
        xs = x_ref[0]                                       # (C_in, L_pad)
        acc = jnp.zeros((C_out, L_out), jnp.float32)
        for k in range(K):                                  # static, unrolled taps
            # tap k of the (K,1) conv == shift of k*V lanes in (T*V)-flat layout
            xk = xs[:, k * V:k * V + L_out]                 # (C_in, L_out)
            acc = acc + jnp.dot(w_ref[k], xk,
                                preferred_element_type=jnp.float32)
        o_ref[0] = (acc + b_ref[...]).astype(o_ref.dtype)   # bias broadcast over lanes

    return kernel


def unit_tcn_forward(x, conv_w, conv_b, bn_gamma, bn_beta, bn_mean, bn_var,
                     *, stride=1, eps=1e-5):
    """x: (N, C_in, T, V) -> (N, C_out, T_out, V), matching bn(conv(x)) in eval mode."""
    N, C_in, T, V = x.shape
    C_out, C_in_w, K, KW = conv_w.shape
    assert C_in_w == C_in and KW == 1
    # TODO(synk): stride > 1 needs a strided temporal gather; only the module
    # default stride=1 is implemented here.
    assert stride == 1
    # TODO(synk): training-mode BatchNorm (batch statistics + running-stat update)
    # is not implemented; eval-mode BN (running stats) is folded into the conv.
    pad = (K - 1) // 2
    T_pad = T + 2 * pad
    T_out = T_pad - K + 1
    L_pad = T_pad * V
    L_out = T_out * V

    # Fold eval-mode BatchNorm into the conv: per-output-channel scale & shift.
    scale = (bn_gamma / jnp.sqrt(bn_var + eps)).astype(jnp.float32)          # (C_out,)
    w = conv_w[..., 0].astype(jnp.float32)                                   # (C_out, C_in, K)
    w_f = jnp.transpose(w * scale[:, None, None], (2, 0, 1))                 # (K, C_out, C_in)
    b_f = scale * (conv_b.astype(jnp.float32) - bn_mean) + bn_beta           # (C_out,)
    b_f = b_f.reshape(C_out, 1).astype(jnp.float32)

    # Zero-pad time and flatten (T_pad, V) onto the lane axis (contiguous reshape).
    xp = jnp.pad(x.astype(jnp.float32), ((0, 0), (0, 0), (pad, pad), (0, 0)))
    xf = xp.reshape(N, C_in, L_pad)

    kernel = _make_tcn_bn_kernel(K, V, C_in, C_out, L_out)
    out = pl.pallas_call(
        kernel,
        out_shape=jax.ShapeDtypeStruct((N, C_out, L_out), jnp.float32),
        grid=(N,),
        in_specs=[
            pl.BlockSpec((1, C_in, L_pad), lambda n: (n, 0, 0)),
            pl.BlockSpec((K, C_out, C_in), lambda n: (0, 0, 0)),
            pl.BlockSpec((C_out, 1), lambda n: (0, 0)),
        ],
        out_specs=pl.BlockSpec((1, C_out, L_out), lambda n: (n, 0, 0)),
        compiler_params=pltpu.CompilerParams(dimension_semantics=("parallel",)),
    )(xf, w_f, b_f)

    # Contiguous (free) reshape back to the PyTorch NCHW-style layout.
    return out.reshape(N, C_out, T_out, V)


def _reference(x, conv_w, conv_b, gamma, beta, mean, var, stride=1, eps=1e-5):
    """Pure-JAX/XLA reference: Conv2d((K,1)) followed by eval-mode BatchNorm2d."""
    K = conv_w.shape[2]
    pad = (K - 1) // 2
    y = jax.lax.conv_general_dilated(
        x.astype(jnp.float32), conv_w.astype(jnp.float32),
        window_strides=(stride, 1), padding=((pad, pad), (0, 0)),
        dimension_numbers=("NCHW", "OIHW", "NCHW"))
    y = y + conv_b[None, :, None, None]
    inv = 1.0 / jnp.sqrt(var + eps)
    return (y - mean[None, :, None, None]) * (gamma * inv)[None, :, None, None] \
        + beta[None, :, None, None]


if __name__ == "__main__":
    key = jax.random.PRNGKey(0)
    N, C_in, T, V = 2, 4, 8, 16          # batch=2, in-channels=4, seq(T)=8, spatial(V)=16
    C_out, K = 32, 5                     # hidden=32, temporal kernel=5 (module default)

    ks = jax.random.split(key, 7)
    x = jax.random.normal(ks[0], (N, C_in, T, V), dtype=jnp.float32)
    conv_w = jax.random.normal(ks[1], (C_out, C_in, K, 1), jnp.float32) * (2.0 / (C_in * K)) ** 0.5
    conv_b = 0.1 * jax.random.normal(ks[2], (C_out,), jnp.float32)
    bn_gamma = 1.0 + 0.1 * jax.random.normal(ks[3], (C_out,), jnp.float32)
    bn_beta = 0.1 * jax.random.normal(ks[4], (C_out,), jnp.float32)
    bn_mean = 0.1 * jax.random.normal(ks[5], (C_out,), jnp.float32)
    bn_var = jnp.abs(1.0 + 0.1 * jax.random.normal(ks[6], (C_out,), jnp.float32))

    out = unit_tcn_forward(x, conv_w, conv_b, bn_gamma, bn_beta, bn_mean, bn_var)
    out = jax.block_until_ready(out)

    ref = _reference(x, conv_w, conv_b, bn_gamma, bn_beta, bn_mean, bn_var)
    assert out.shape == (N, C_out, T, V), out.shape
    assert bool(jnp.allclose(out, ref, atol=1e-4, rtol=1e-4)), \
        float(jnp.max(jnp.abs(out - ref)))
    print("KERNEL_OK")
</pallas_src>

<mosaic_0001>
module attributes {stable_mosaic.version = 11 : i64} {
  func.func @kernel(%arg0: i32, %arg1: memref<1x4x192xf32, #tpu.memory_space<vmem>>, %arg2: memref<5x32x4xf32, #tpu.memory_space<vmem>>, %arg3: memref<32x1xf32, #tpu.memory_space<vmem>>, %arg4: memref<1x32x128xf32, #tpu.memory_space<vmem>>) attributes {dimension_semantics = [#tpu.dimension_semantics<parallel>], iteration_bounds = array<i64: 2>, scalar_prefetch = 0 : i64, scratch_operands = 0 : i64, tpu.core_type = #tpu.core_type<tc>, window_params = [{transform_indices = @transform_0, window_bounds = array<i64: 1, 4, 192>}, {pipeline_mode = #tpu.pipeline_mode<synchronous>, transform_indices = @transform_1, window_bounds = array<i64: 5, 32, 4>}, {pipeline_mode = #tpu.pipeline_mode<synchronous>, transform_indices = @transform_2, window_bounds = array<i64: 32, 1>}, {transform_indices = @transform_3, window_bounds = array<i64: 1, 32, 128>}]} {
    %c0 = arith.constant 0 : index
    %c0_0 = arith.constant 0 : index
    %c0_1 = arith.constant 0 : index
    %0 = vector.load %arg1[%c0, %c0_0, %c0_1] : memref<1x4x192xf32, #tpu.memory_space<vmem>>, vector<1x4x192xf32>
    %1 = vector.shape_cast %0 : vector<1x4x192xf32> to vector<4x192xf32>
    %cst = arith.constant 0.000000e+00 : f32
    %2 = vector.broadcast %cst : f32 to vector<32x128xf32>
    %3 = vector.extract_strided_slice %1 {offsets = [0, 0], sizes = [4, 128], strides = [1, 1]} : vector<4x192xf32> to vector<4x128xf32>
    %c0_2 = arith.constant 0 : index
    %c0_3 = arith.constant 0 : index
    %c0_4 = arith.constant 0 : index
    %4 = vector.load %arg2[%c0_2, %c0_3, %c0_4] : memref<5x32x4xf32, #tpu.memory_space<vmem>>, vector<1x32x4xf32>
    %5 = vector.shape_cast %4 : vector<1x32x4xf32> to vector<32x4xf32>
    %cst_5 = arith.constant dense<0.000000e+00> : vector<32x128xf32>
    %6 = tpu.matmul %5, %3, %cst_5 {dimension_numbers = #tpu.dot_dimension_numbers<[1], [0], [0], [1], [0, 0, 1, 1], [], []>} : vector<32x4xf32>, vector<4x128xf32>, vector<32x128xf32> -> vector<32x128xf32>
    %7 = arith.addf %2, %6 : vector<32x128xf32>
    %8 = vector.extract_strided_slice %1 {offsets = [0, 16], sizes = [4, 128], strides = [1, 1]} : vector<4x192xf32> to vector<4x128xf32>
    %c1 = arith.constant 1 : index
    %c0_6 = arith.constant 0 : index
    %c0_7 = arith.constant 0 : index
    %9 = vector.load %arg2[%c1, %c0_6, %c0_7] : memref<5x32x4xf32, #tpu.memory_space<vmem>>, vector<1x32x4xf32>
    %10 = vector.shape_cast %9 : vector<1x32x4xf32> to vector<32x4xf32>
    %cst_8 = arith.constant dense<0.000000e+00> : vector<32x128xf32>
    %11 = tpu.matmul %10, %8, %cst_8 {dimension_numbers = #tpu.dot_dimension_numbers<[1], [0], [0], [1], [0, 0, 1, 1], [], []>} : vector<32x4xf32>, vector<4x128xf32>, vector<32x128xf32> -> vector<32x128xf32>
    %12 = arith.addf %7, %11 : vector<32x128xf32>
    %13 = vector.extract_strided_slice %1 {offsets = [0, 32], sizes = [4, 128], strides = [1, 1]} : vector<4x192xf32> to vector<4x128xf32>
    %c2 = arith.constant 2 : index
    %c0_9 = arith.constant 0 : index
    %c0_10 = arith.constant 0 : index
    %14 = vector.load %arg2[%c2, %c0_9, %c0_10] : memref<5x32x4xf32, #tpu.memory_space<vmem>>, vector<1x32x4xf32>
    %15 = vector.shape_cast %14 : vector<1x32x4xf32> to vector<32x4xf32>
    %cst_11 = arith.constant dense<0.000000e+00> : vector<32x128xf32>
    %16 = tpu.matmul %15, %13, %cst_11 {dimension_numbers = #tpu.dot_dimension_numbers<[1], [0], [0], [1], [0, 0, 1, 1], [], []>} : vector<32x4xf32>, vector<4x128xf32>, vector<32x128xf32> -> vector<32x128xf32>
    %17 = arith.addf %12, %16 : vector<32x128xf32>
    %18 = vector.extract_strided_slice %1 {offsets = [0, 48], sizes = [4, 128], strides = [1, 1]} : vector<4x192xf32> to vector<4x128xf32>
    %c3 = arith.constant 3 : index
    %c0_12 = arith.constant 0 : index
    %c0_13 = arith.constant 0 : index
    %19 = vector.load %arg2[%c3, %c0_12, %c0_13] : memref<5x32x4xf32, #tpu.memory_space<vmem>>, vector<1x32x4xf32>
    %20 = vector.shape_cast %19 : vector<1x32x4xf32> to vector<32x4xf32>
    %cst_14 = arith.constant dense<0.000000e+00> : vector<32x128xf32>
    %21 = tpu.matmul %20, %18, %cst_14 {dimension_numbers = #tpu.dot_dimension_numbers<[1], [0], [0], [1], [0, 0, 1, 1], [], []>} : vector<32x4xf32>, vector<4x128xf32>, vector<32x128xf32> -> vector<32x128xf32>
    %22 = arith.addf %17, %21 : vector<32x128xf32>
    %23 = vector.extract_strided_slice %1 {offsets = [0, 64], sizes = [4, 128], strides = [1, 1]} : vector<4x192xf32> to vector<4x128xf32>
    %c4 = arith.constant 4 : index
    %c0_15 = arith.constant 0 : index
    %c0_16 = arith.constant 0 : index
    %24 = vector.load %arg2[%c4, %c0_15, %c0_16] : memref<5x32x4xf32, #tpu.memory_space<vmem>>, vector<1x32x4xf32>
    %25 = vector.shape_cast %24 : vector<1x32x4xf32> to vector<32x4xf32>
    %cst_17 = arith.constant dense<0.000000e+00> : vector<32x128xf32>
    %26 = tpu.matmul %25, %23, %cst_17 {dimension_numbers = #tpu.dot_dimension_numbers<[1], [0], [0], [1], [0, 0, 1, 1], [], []>} : vector<32x4xf32>, vector<4x128xf32>, vector<32x128xf32> -> vector<32x128xf32>
    %27 = arith.addf %22, %26 : vector<32x128xf32>
    %c0_18 = arith.constant 0 : index
    %c0_19 = arith.constant 0 : index
    %28 = vector.load %arg3[%c0_18, %c0_19] : memref<32x1xf32, #tpu.memory_space<vmem>>, vector<32x1xf32>
    %29 = vector.broadcast %28 : vector<32x1xf32> to vector<32x128xf32>
    %30 = arith.addf %27, %29 : vector<32x128xf32>
    %c0_20 = arith.constant 0 : index
    %c0_21 = arith.constant 0 : index
    %c0_22 = arith.constant 0 : index
    %31 = vector.load %arg4[%c0_20, %c0_21, %c0_22] : memref<1x32x128xf32, #tpu.memory_space<vmem>>, vector<1x32x128xf32>
    %32 = vector.shape_cast %31 : vector<1x32x128xf32> to vector<32x128xf32>
    %33 = vector.shape_cast %30 : vector<32x128xf32> to vector<1x32x128xf32>
    tpu.vector_store %arg4[%c0_20, %c0_21, %c0_22], %33 {strides = array<i32>} : memref<1x32x128xf32, #tpu.memory_space<vmem>>, vector<1x32x128xf32>,
    return
  }
  func.func @transform_0(%arg0: i32) -> (i32, i32, i32) {
    %c0_i32 = arith.constant 0 : i32
    %c0_i32_0 = arith.constant 0 : i32
    %c0_i32_1 = arith.constant 0 : i32
    return %arg0, %c0_i32, %c0_i32_0 : i32, i32, i32
  }
  func.func @transform_1(%arg0: i32) -> (i32, i32, i32) {
    %c0_i32 = arith.constant 0 : i32
    %c0_i32_0 = arith.constant 0 : i32
    %c0_i32_1 = arith.constant 0 : i32
    %c0_i32_2 = arith.constant 0 : i32
    return %c0_i32, %c0_i32_0, %c0_i32_1 : i32, i32, i32
  }
  func.func @transform_2(%arg0: i32) -> (i32, i32) {
    %c0_i32 = arith.constant 0 : i32
    %c0_i32_0 = arith.constant 0 : i32
    %c0_i32_1 = arith.constant 0 : i32
    return %c0_i32, %c0_i32_0 : i32, i32
  }
  func.func @transform_3(%arg0: i32) -> (i32, i32, i32) {
    %c0_i32 = arith.constant 0 : i32
    %c0_i32_0 = arith.constant 0 : i32
    %c0_i32_1 = arith.constant 0 : i32
    return %arg0, %c0_i32, %c0_i32_0 : i32, i32, i32
  }
}

</mosaic_0001>

<bundles_post_ra>
// kernel: tpu_custom_call.1
= control target key start
LH: loop header
LB: loop body
LE: loop exit
PB: predicated region body
PF: predicated region fallthrough
CT: control target
= control target key end

     0   :  { %8 = vsyncpa [#allocation3], 0  ;;  %s1308_s0 = inlined_call_operand.vmem [shape: f32[2,4,192], index: 0, kind: input, shape index: {}]   ;;  %s1309_s1 = inlined_call_operand.vmem [shape: f32[5,32,4], index: 1, kind: input, shape index: {}]   ;;  %s1310_s2 = inlined_call_operand.vmem [shape: f32[32,1], index: 2, kind: input, shape index: {}]   ;;  %s1311_s3 = inlined_call_operand.hbm [shape: f32[2,32,128], index: 3, kind: output, shape index: {}]  }
   0x1   :  { %10 = vsyncpa [#allocation3 + $0x1], 0  ;;  %s1098_s12 = smov 0   ;;  %s1100_s13 = smov 0  }
   0x2   :  { %s1102_s14 = smov 0   ;;  %s1104_s15 = smov 0  }
   0x3 LB: > { %s1119_s16 = sadd.s32 4294967295, %s1068_s15   ;;  %s837_s17 = sadd.s32 4294967294, %s1068_s15   ;;  %s1068_s15 = sphi %s1104_s15, %s1317_s15   ;;  %s1064_s14 = sphi %s1102_s14, %s1316_s14   ;;  %s1060_s13 = sphi %s1100_s13, %s1315_s13   ;;  %s1056_s12 = sphi %s1098_s12, %s1314_s12  }
   0x4   : > { %s1123_s18 = sadd.s32 1, %s1068_s15   ;;  %s91_s19 = sadd.s32 1, %s1064_s14 }
   0x5   : > { %s88_s20 = ssub.s32 %s1068_s15, %s1123_s18  ;;  %p101_p0 = scmp.ne.s32.totalorder %s1064_s14, %s1060_s13 }
   0x6   : > { %p89_p1 = scmp.eq.s32.totalorder %s88_s20, 0  ;;  %p102_p2 = scmp.eq.s32.totalorder %s1119_s16, 1 }
   0x7   : > { %p107_p3 = scmp.ne.s32.totalorder %s1060_s13, %s1056_s12  ;;  %p108_p4 = scmp.eq.s32.totalorder %s837_s17, 1 }
   0x8   : > { %s1134_s21 = scalar_select %p89_p1, %s1064_s14, %s91_s19  }
   0x9   : > { %p1136_p5 = por %p102_p2, %p101_p0  ;;  %p1140_p6 = por %p108_p4, %p107_p3 }
   0xa   : > { %p840_p7 = scmp.ge.s32.totalorder %s1068_s15, 1  ;;  %p140_p8 = scmp.lt.s32.totalorder %s1068_s15, 3 }
   0xc   : > { %p141_p9 = pnand %p840_p7, %p140_p8 }
   0xd   : > { %p164_p10 = scmp.lt.s32.totalorder (!%p141_p9), %s1119_s16, 1  ;;  %s1070_s6 = smov (!%p141_p9), 96  }
   0xe   : > { %144 = sbr.rel (%p141_p9) target bundleno = 377 (0x179), region = 32  ;;  %s1071_s7 = smov (!%p141_p9), 112  }
   0xf   : > { %s1072_s8 = smov (!%p141_p9), 80   ;;  %s1073_s9 = smov (!%p141_p9), 64  }
  0x10   : > { %s161_s27 = sand.u32 (!%p141_p9), 1, %s1060_s13   ;;  %s891_s4 = sshll.u32 (!%p141_p9), %s1119_s16, 9 }
  0x13   : > { %v846_v0 = vld [vmem:[%s1309_s1 + $0x30] sm:$0xff]  ;;  %vm187_vm0 = vcmask 31744   ;;  %v844_v1 = vld [vmem:[%s1309_s1 + $0x20] sm:$0xff]  ;;  %s165_s28 = scalar_select %p164_p10, %s1119_s16, 1  ;;  %v1074_v4 = vmov 0   ;;  %v730_v5 = vld [vmem:[%s1310_s2 + $0x8] sm:$0xff] }
  0x14   : > { %922 = vmatprep.mubr.msk.f32.mxu1 %vm187_vm0, %v846_v0  ;;  %919 = vmatprep.mubr.msk.f32.mxu0 %vm187_vm0, %v844_v1  ;;  %v729_v6 = vld [vmem:[%s1310_s2] sm:$0xff]  ;;  %v731_v7 = vld [vmem:[%s1310_s2 + $0x10] sm:$0xff]  ;;  %v732_v8 = vld [vmem:[%s1310_s2 + $0x18] sm:$0xff]  ;;  %vm185_vm1 = vcmask 916480   ;;  %vm396_vm2 = vcmask 785408   ;;  %vm200_vm3 = vcmask 1043456  }
  0x15   : > { %s890_s29 = sshll.u32 %s165_s28, 3  ;;  %1006 = vset.pattern.permute.xlu1 %v1074_v4  ;;  %1005 = vset.pattern.permute.xlu0 %v1074_v4  ;;  %v847_v14 = vld [vmem:[%s1309_s1 + $0x38] sm:$0xff]  ;;  %vm510_vm4 = vcmask 654336   ;;  %v845_v16 = vld [vmem:[%s1309_s1 + $0x28] sm:$0xff]  ;;  %v170_v19 = vld [vmem:[%s1309_s1] sm:$0xff]  ;;  %vm624_vm5 = vcmask 523264  }
  0x16   : > { %s168_s5 = scalar_lea.vmem %s1308_s0, %s890_s29  ;;  %v171_v21 = vld [vmem:[%s1309_s1 + $0x8] sm:$0xff]  ;;  %v858_v22 = vld [vmem:[%s1309_s1 + $0x40] sm:$0xff]  ;;  %v172_v24 = vld [vmem:[%s1309_s1 + $0x10] sm:$0xff]  ;;  %s841_s28 = sshll.u32 %s161_s27, 5 }
  0x17   : > { %v169_v2 = vld [vmem:[%s168_s5] sm:$0xff]  ;;  %v859_v23 = vld [vmem:[%s1309_s1 + $0x48] sm:$0xff]  ;;  %v860_v27 = vld [vmem:[%s1309_s1 + $0x50] sm:$0xff]  ;;  %s163_s29 = scalar_lea.vmem [#allocation2], %s841_s28 }
  0x18   : > { %392 = vrot.lane.b32.xlu1 %v169_v2, %s1070_s6  ;;  %181 = vrot.lane.b32.xlu0 %v169_v2, %s1071_s7  ;;  %v180_v3 = vcombine.high %v169_v2, %v169_v2  ;;  %v173_v29 = vld [vmem:[%s1309_s1 + $0x18] sm:$0xff]  ;;  %v867_v31 = vld [vmem:[%s1309_s1 + $0x60] sm:$0xff]  ;;  %s775_s30 = sshll.u32 %s163_s29, 4  ;;  %s1259_s30 = int_to_ptr.vmem [resolvable:$true] %s775_s30 }
  0x19   : > { %v861_v30 = vld [vmem:[%s1309_s1 + $0x58] sm:$0xff]  ;;  %v876_v32 = vld [vmem:[%s1309_s1 + $0x80] sm:$0xff]  ;;  %v868_v33 = vld [vmem:[%s1309_s1 + $0x68] sm:$0xff]  ;;  %s1008_s16 = scalar_lea.vmem %s1259_s30, 512 }
  0x1a   : > { %v877_v34 = vld [vmem:[%s1309_s1 + $0x88] sm:$0xff]  ;;  %v869_v35 = vld [vmem:[%s1309_s1 + $0x70] sm:$0xff]  ;;  %v870_v37 = vld [vmem:[%s1309_s1 + $0x78] sm:$0xff]  ;;  %p1009_p11 = scmp.ne.s32.totalorder %s1259_s30, %s1008_s16 }
  0x1b   : > { %v878_v36 = vld [vmem:[%s1309_s1 + $0x90] sm:$0xff]  ;;  %v879_v38 = vld [vmem:[%s1309_s1 + $0x98] sm:$0xff] }
  0x1c   : > { %394 = vrot.lane.b32.xlu1 %v180_v3, %s1070_s6  ;;  %183 = vrot.lane.b32.xlu0 %v180_v3, %s1071_s7  ;;  %s1264_s7 = scalar_lea.hbm %s1311_s3, %s891_s4  ;;  %p1010_p12 = pnand %p1009_p11, %p1136_p5 }
  0x1e   : > { %p1011_p13 = pneg %p1010_p12 }
  0x20   : > { %508 = vrot.lane.b32.xlu1 %v180_v3, %s1072_s8  ;;  %506 = vrot.lane.b32.xlu0 %v169_v2, %s1072_s8  ;;  %s1268_s8 = scalar_lea.sflag [#allocation3], %s161_s27 }
  0x24   : > { %622 = vrot.lane.b32.xlu1 %v180_v3, %s1073_s9  ;;  %620 = vrot.lane.b32.xlu0 %v169_v2, %s1073_s9  ;;  %s1075_s9 = smov [#allocation2]  }
  0x25   : > { %s1012_s10 = sshll.u32 %s1075_s9, 4  ;;  %s1013_s10 = int_to_ptr.vmem [resolvable:$false] %s1012_s10 }
  0x26   : > { %s1014_s11 = scalar_lea.vmem %s1013_s10, 1024  ;;  %p1015_p0 = scmp.lt.s32.totalorder %s1259_s30, %s1013_s10 }
  0x27   : > { %p1016_p1 = scmp.lt.s32.totalorder %s1014_s11, %s1008_s16 }
  0x28   : > { %740 = vperm.xlu1 %1006, %v730_v5   ;;  %735 = vperm.xlu0 %1005, %v729_v6  }
  0x29   : > { %p1017_p2 = por %p1016_p1, %p1015_p0 }
  0x2b   : > { %p1018_p3 = pnand %p1017_p2, %p1011_p13 }
  0x2c   : > { %745 = vperm.xlu1 %1006, %v731_v7   ;;  %750 = vperm.xlu0 %1005, %v732_v8  }
  0x8a   : > { %v393_v9 = vpop.permute.xlu1 %392  ;;  %v182_v10 = vpop.permute.xlu0 %181 }
  0x8e   : > { %v395_v11 = vpop.permute.xlu1 %394  ;;  %v184_v12 = vpop.permute.xlu0 %183 }
  0x8f   : > { %v186_v13 = vsel %vm185_vm1, %v182_v10, %v184_v12  ;;  %v397_v15 = vsel %vm396_vm2, %v393_v9, %v395_v11 }
  0x90   : > { %917 = vmatprep.subr.msk.mxu0 %vm200_vm3, %v186_v13  ;;  %957 = vmatprep.subr.msk.mxu1 %vm200_vm3, %v186_v13 }
  0x91   : > { %918 = vmatpush3.msk.msra.mxu0 %vm200_vm3, %v186_v13  ;;  %958 = vmatpush3.msk.msra.mxu1 %vm200_vm3, %v186_v13 }
  0x92   : > { %v509_v17 = vpop.permute.xlu1 %508  ;;  %923 = vmatmul.mubr.msk.f32.vlgmr.msra.gmra.mxu1 %vm187_vm0, %v847_v14  ;;  %925 = vmatprep.subr.msk.mxu1 %vm200_vm3, %v169_v2  ;;  %v507_v18 = vpop.permute.xlu0 %506 }
  0x93   : > { %933 = vmatprep.subr.msk.mxu0 %vm200_vm3, %v397_v15  ;;  %v511_v20 = vsel %vm510_vm4, %v507_v18, %v509_v17  ;;  %920 = vmatmul.mubr.msk.f32.vlgmr.msra.gmra.mxu0 %vm187_vm0, %v845_v16 }
  0x94   : > { %926 = vmatpush3.msk.msra.mxu1 %vm200_vm3, %v169_v2  ;;  %934 = vmatpush3.msk.msra.mxu0 %vm200_vm3, %v397_v15 }
  0x95   : > { %941 = vmatprep.subr.msk.mxu1 %vm200_vm3, %v511_v20  ;;  %927 = vmatprep.mubr.msk.f32.mxu1 %vm187_vm0, %v170_v19 }
  0x96   : > { %v623_v25 = vpop.permute.xlu1 %622  ;;  %928 = vmatmul.mubr.msk.f32.vlgmr.msra.gmra.mxu1 %vm187_vm0, %v171_v21  ;;  %935 = vmatprep.mubr.msk.f32.mxu0 %vm187_vm0, %v858_v22  ;;  %v621_v26 = vpop.permute.xlu0 %620 }
  0x97   : > { %942 = vmatpush3.msk.msra.mxu1 %vm200_vm3, %v511_v20  ;;  %v625_v28 = vsel %vm624_vm5, %v621_v26, %v623_v25  ;;  %936 = vmatmul.mubr.msk.f32.vlgmr.msra.gmra.mxu0 %vm187_vm0, %v859_v23 }
  0x98   : > { %949 = vmatprep.subr.msk.mxu0 %vm200_vm3, %v625_v28  ;;  %930 = vmatprep.mubr.msk.f32.mxu1 %vm187_vm0, %v172_v24 }
  0x99   : > { %950 = vmatpush3.msk.msra.mxu0 %vm200_vm3, %v625_v28  ;;  %938 = vmatprep.mubr.msk.f32.mxu0 %vm187_vm0, %v860_v27 }
  0x9a   : > { %931 = vmatmul.mubr.msk.f32.gmra.mxu1 %vm187_vm0, %v173_v29 }
  0x9b   : > { %939 = vmatmul.mubr.msk.f32.gmra.mxu0 %vm187_vm0, %v861_v30  ;;  %943 = vmatprep.mubr.msk.f32.mxu1 %vm187_vm0, %v867_v31 }
  0x9c   : > { %951 = vmatprep.mubr.msk.f32.mxu0 %vm187_vm0, %v876_v32 }
  0x9e   : > { %944 = vmatmul.mubr.msk.f32.vlgmr.msra.gmra.mxu1 %vm187_vm0, %v868_v33 }
  0x9f   : > { %952 = vmatmul.mubr.msk.f32.vlgmr.msra.gmra.mxu0 %vm187_vm0, %v877_v34  ;;  %946 = vmatprep.mubr.msk.f32.mxu1 %vm187_vm0, %v869_v35 }
  0xa0   : > { %954 = vmatprep.mubr.msk.f32.mxu0 %vm187_vm0, %v878_v36 }
  0xa2   : > { %947 = vmatmul.mubr.msk.f32.gmra.mxu1 %vm187_vm0, %v870_v37 }
  0xa3   : > { %955 = vmatmul.mubr.msk.f32.gmra.mxu0 %vm187_vm0, %v879_v38  ;;  %v736_v61 = vpop.permute.xlu0 %735  ;;  %v741_v2 = vpop.permute.xlu1 %740 }
  0xa7   : > { %v751_v14 = vpop.permute.xlu0 %750  ;;  %v746_v17 = vpop.permute.xlu1 %745 }
 0x152   : > { %v924_v39 = vpop.f32.mrf.mxu1 }
 0x153   : > { %v921_v40 = vpop.f32.mrf.mxu0 }
 0x154   : > { %v279_v41 = vpop.f32.mrf.mxu1 }
 0x155   : > { %v269_v42 = vpop.f32.mrf.mxu0 }
 0x156   : > { %v929_v43 = vpop.f32.mrf.mxu1 }
 0x157   : > { %v937_v44 = vpop.f32.mrf.mxu0  ;;  %v374_v46 = vadd.f32 %v929_v43, %v921_v40 }
 0x158   : > { %v368_v45 = vpop.f32.mrf.mxu1 }
 0x159   : > { %v478_v47 = vpop.f32.mrf.mxu0  ;;  %v369_v49 = vadd.f32 %v368_v45, %v269_v42  ;;  %v498_v52 = vadd.f32 %v937_v44, %v374_v46 }
 0x15a   : > { %v932_v48 = vpop.f32.mrf.mxu1 }
 0x15b   : > { %v940_v50 = vpop.f32.mrf.mxu0  ;;  %v384_v53 = vadd.f32 %v932_v48, %v924_v39  ;;  %v497_v56 = vadd.f32 %v478_v47, %v369_v49 }
 0x15c   : > { %v378_v51 = vpop.f32.mrf.mxu1 }
 0x15d   : > { %v488_v54 = vpop.f32.mrf.mxu0  ;;  %v379_v57 = vadd.f32 %v378_v51, %v279_v41  ;;  %v500_v62 = vadd.f32 %v940_v50, %v384_v53 }
 0x15e   : > { %v945_v55 = vpop.f32.mrf.mxu1 }
 0x15f   : > { %v612_v58 = vadd.f32 %v945_v55, %v498_v52  ;;  %v953_v59 = vpop.f32.mrf.mxu0  ;;  %v499_v4 = vadd.f32 %v488_v54, %v379_v57 }
 0x160   : > { %v592_v60 = vpop.f32.mrf.mxu1 }
 0x161   : > { %v726_v63 = vadd.f32 %v953_v59, %v612_v58  ;;  %v611_v0 = vadd.f32 %v592_v60, %v497_v56  ;;  %v706_v1 = vpop.f32.mrf.mxu0 }
 0x162   : > { %v948_v3 = vpop.f32.mrf.mxu1 }
 0x163   : > { %v754_v5 = vadd.f32 %v741_v2, %v726_v63  ;;  %v725_v6 = vadd.f32 %v706_v1, %v611_v0  ;;  %v614_v7 = vadd.f32 %v948_v3, %v500_v62  ;;  %v956_v8 = vpop.f32.mrf.mxu0 }
 0x164   : > { %v602_v9 = vpop.f32.mrf.mxu1 }
 0x165   : > { %758 = vst [vmem:[%s163_s29 + $0x8] sm:$0xff] %v754_v5  ;;  %v753_v10 = vadd.f32 %v736_v61, %v725_v6  ;;  %v728_v11 = vadd.f32 %v956_v8, %v614_v7  ;;  %v613_v12 = vadd.f32 %v602_v9, %v499_v4  ;;  %v716_v13 = vpop.f32.mrf.mxu0 }
 0x167   : > { %757 = vst [vmem:[%s163_s29] sm:$0xff] %v753_v10  ;;  %v727_v15 = vadd.f32 %v716_v13, %v613_v12  ;;  %v756_v16 = vadd.f32 %v751_v14, %v728_v11 }
 0x169   : > { %v755_v18 = vadd.f32 %v746_v17, %v727_v15  ;;  %760 = vst [vmem:[%s163_s29 + $0x18] sm:$0xff] %v756_v16 }
 0x16b   : > { %759 = vst [vmem:[%s163_s29 + $0x10] sm:$0xff] %v755_v18 }
 0x16c   : > { %1021 = shalt.err (!%p1018_p3)
}
 0x16d   : > { %s1022_s17 = scalar_lea.hbm %s1264_s7, 512  ;;  %s1026_s24 = scalar_lea.hbm %s1311_s3, 1024 }
 0x16e   : > { %p1023_p4 = scmp.ne.s32.totalorder %s1264_s7, %s1022_s17  ;;  %p1027_p9 = scmp.lt.s32.totalorder %s1264_s7, %s1311_s3 }
 0x16f   : > { %p1028_p10 = scmp.lt.s32.totalorder %s1026_s24, %s1022_s17 }
 0x170   : > { %p1024_p7 = pnand %p1023_p4, %p1136_p5 }
 0x171   : > { %p1029_p11 = por %p1028_p10, %p1027_p9 }
 0x172   : > { %p1025_p8 = pneg %p1024_p7 }
 0x174   : > { %p1030_p12 = pnand %p1029_p11, %p1025_p8 }
 0x176   : > { %1033 = shalt.err (!%p1030_p12)
}
 0x177   : > { %s1076_s27 = smov 128   ;;  %s1077_s28 = smov 8  }
 0x178   : > { %959 = dma.vmem_to_hbm [thread:$0]  (%p1136_p5), %s1259_s30, 512, %s1264_s7, %s1268_s8, %s1076_s27, %s1076_s27, %s1077_s28  }
 0x179 PF: > { %p965_p13 = scmp.ge.s32.totalorder %s1068_s15, 2  ;;  %s790_s29 = sand.u32 1, %s1056_s12  }
 0x17a   : > { %s791_s4 = scalar_lea.sflag [#allocation3], %s790_s29 }
 0x17b   : > { %p962_p0 = pnand %p965_p13, %p1140_p6 }
 0x17d   : > { %p963_p1 = pneg %p962_p0 }
 0x17f   : > { %1051 = dma.done.wait (%p963_p1), %s791_s4, 512  }
 0x180   : > { %1053 = vsyncadd (%p963_p1), %s791_s4, 4294966784  ;;  %p13_p2 = scmp.ge.s32.totalorder %s1123_s18, 4   ;;  %s1314_s12 = smov %s1060_s13 }
 0x181   : > { %s1315_s13 = smov %s1064_s14  ;;  %s1316_s14 = smov %s1134_s21 }
 0x182   : > { %s1317_s15 = smov %s1123_s18  ;;  %15 = sbr.rel (!%p13_p2) target bundleno = 3 (0x3), region = 71 }
 0x187   :  { %796 = vsyncpa [#allocation3], 1 }
 0x188   :  { %798 = vsyncpa [#allocation3 + $0x1], 1 }

</bundles_post_ra>
